<compile_context>
chip_gen: v6e
topology: v6e:2x2x1
jax: 0.10.0
libtpu: 0.0.40
codegen_flags: <defaults>
</compile_context>

<pallas_src>
import jax
import jax.numpy as jnp
from jax.experimental import pallas as pl
from jax.experimental.pallas import tpu as pltpu

_LANES = 128


def _mlp_kernel(x_ref, w1_ref, b1_ref, w2_ref, b2_ref, w3_ref, b3_ref,
                w4_ref, b4_ref, o_ref):
    """One batch tile of the 4-layer MLP. Weights arrive as bf16."""
    x = x_ref[...].astype(jnp.bfloat16)

    h = jnp.dot(x, w1_ref[...], preferred_element_type=jnp.float32) + b1_ref[...]
    h = jnp.maximum(h, 0.0)

    h = jnp.dot(h.astype(jnp.bfloat16), w2_ref[...],
                preferred_element_type=jnp.float32) + b2_ref[...]
    h = jnp.maximum(h, 0.0)

    h = jnp.dot(h.astype(jnp.bfloat16), w3_ref[...],
                preferred_element_type=jnp.float32) + b3_ref[...]
    h = jnp.maximum(h, 0.0)

    logits = jnp.dot(h.astype(jnp.bfloat16), w4_ref[...],
                     preferred_element_type=jnp.float32) + b4_ref[...]

    # sigmoid(z) = 1 / (1 + exp(-z)): exp on EUP, approx reciprocal on EUP,
    # no f32 division on the VPU.
    e = jnp.exp(-logits)
    o_ref[...] = pl.reciprocal(1.0 + e, approx=True).astype(o_ref.dtype)


def _round_up(v, m):
    return (v + m - 1) // m * m


def torcs_mlp_forward(x, params, *, tile_batch=512):
    """x: (B, num_features) f32. params: dict of transposed weights/biases.

    tile_batch: rows per grid step. Large batches are streamed through a
    pipelined batch grid; weights stay resident in VMEM.
    """
    B, F = x.shape
    hidden = params["w1"].shape[1]
    num_output = params["w4"].shape[1]

    # --- lane-dense output: pad output features to a multiple of 128 ---------
    out_pad = _round_up(num_output, _LANES)
    w4 = jnp.pad(params["w4"], ((0, 0), (0, out_pad - num_output)))
    b4 = jnp.pad(params["b4"], ((0, 0), (0, out_pad - num_output)))

    # --- bf16 weights for the MXU; biases stay f32 ---------------------------
    w1 = params["w1"].astype(jnp.bfloat16)
    w2 = params["w2"].astype(jnp.bfloat16)
    w3 = params["w3"].astype(jnp.bfloat16)
    w4 = w4.astype(jnp.bfloat16)
    b1, b2, b3 = params["b1"], params["b2"], params["b3"]

    # --- batch tiling ---------------------------------------------------------
    tb = min(tile_batch, _round_up(B, 8))       # multiple of 8 sublanes
    b_pad = _round_up(B, tb)
    if b_pad != B:
        x = jnp.pad(x, ((0, b_pad - B), (0, 0)))
    grid = (b_pad // tb,)

    def const2(i):          # weights / biases: resident, never re-fetched
        return (0, 0)

    operands = (x, w1, b1, w2, b2, w3, b3, w4, b4)
    in_specs = [pl.BlockSpec((tb, F), lambda i: (i, 0))] + [
        pl.BlockSpec(op.shape, const2) for op in operands[1:]
    ]

    out = pl.pallas_call(
        _mlp_kernel,
        out_shape=jax.ShapeDtypeStruct((b_pad, out_pad), jnp.float32),
        grid=grid,
        in_specs=in_specs,
        out_specs=pl.BlockSpec((tb, out_pad), lambda i: (i, 0)),
        compiler_params=pltpu.CompilerParams(
            dimension_semantics=("parallel",)),   # shards batch across v7x TCs
    )(*operands)

    return out[:B, :num_output]


def init_params(key, num_features, num_nodes_hidden, num_output):
    """Deterministic init mimicking nn.Linear default (uniform +-1/sqrt(fan_in)).

    Weights are stored as (in_dim, out_dim) — i.e. already transposed vs PyTorch.
    """
    dims = [
        (num_features, num_nodes_hidden),
        (num_nodes_hidden, num_nodes_hidden),
        (num_nodes_hidden, num_nodes_hidden),
        (num_nodes_hidden, num_output),
    ]
    params = {}
    keys = jax.random.split(key, 2 * len(dims))
    for idx, (fan_in, fan_out) in enumerate(dims):
        bound = 1.0 / jnp.sqrt(jnp.float32(fan_in))
        w = jax.random.uniform(keys[2 * idx], (fan_in, fan_out),
                               minval=-bound, maxval=bound, dtype=jnp.float32)
        b = jax.random.uniform(keys[2 * idx + 1], (1, fan_out),
                               minval=-bound, maxval=bound, dtype=jnp.float32)
        params[f"w{idx + 1}"] = w
        params[f"b{idx + 1}"] = b
    return params


def reference_forward(x, params):
    """Same math as the kernel (bf16 matmul inputs, f32 accum, exact sigmoid)."""
    def dot(a, w):
        return jnp.dot(a.astype(jnp.bfloat16), w.astype(jnp.bfloat16),
                       preferred_element_type=jnp.float32)

    h = jnp.maximum(dot(x, params["w1"]) + params["b1"], 0.0)
    h = jnp.maximum(dot(h, params["w2"]) + params["b2"], 0.0)
    h = jnp.maximum(dot(h, params["w3"]) + params["b3"], 0.0)
    return jax.nn.sigmoid(dot(h, params["w4"]) + params["b4"])


if __name__ == "__main__":
    num_features = 16      # e.g. TORCS sensor features
    num_nodes_hidden = 32
    num_output = 4
    batch = 8

    key = jax.random.PRNGKey(0)
    k_params, k_x, k_x2 = jax.random.split(key, 3)
    params = init_params(k_params, num_features, num_nodes_hidden, num_output)

    # --- small batch: single grid step, everything VMEM-resident -------------
    x = jax.random.normal(k_x, (batch, num_features), dtype=jnp.float32)
    out = jax.block_until_ready(torcs_mlp_forward(x, params))
    ref = reference_forward(x, params)
    assert out.shape == (batch, num_output)
    assert jnp.allclose(out, ref, atol=5e-3, rtol=5e-3)

    # --- ragged batch exercising the tiled (multi-step, padded) grid path ----
    x2 = jax.random.normal(k_x2, (40, num_features), dtype=jnp.float32)
    out2 = jax.block_until_ready(torcs_mlp_forward(x2, params, tile_batch=16))
    ref2 = reference_forward(x2, params)
    assert out2.shape == (40, num_output)
    assert jnp.allclose(out2, ref2, atol=5e-3, rtol=5e-3)

    print("KERNEL_OK")
</pallas_src>

<mosaic_0001>
module attributes {stable_mosaic.version = 11 : i64} {
  func.func @_mlp_kernel(%arg0: i32, %arg1: memref<8x16xf32, #tpu.memory_space<vmem>>, %arg2: memref<16x32xbf16, #tpu.memory_space<vmem>>, %arg3: memref<1x32xf32, #tpu.memory_space<vmem>>, %arg4: memref<32x32xbf16, #tpu.memory_space<vmem>>, %arg5: memref<1x32xf32, #tpu.memory_space<vmem>>, %arg6: memref<32x32xbf16, #tpu.memory_space<vmem>>, %arg7: memref<1x32xf32, #tpu.memory_space<vmem>>, %arg8: memref<32x128xbf16, #tpu.memory_space<vmem>>, %arg9: memref<1x128xf32, #tpu.memory_space<vmem>>, %arg10: memref<8x128xf32, #tpu.memory_space<vmem>>) attributes {dimension_semantics = [#tpu.dimension_semantics<parallel>], iteration_bounds = array<i64: 1>, scalar_prefetch = 0 : i64, scratch_operands = 0 : i64, tpu.core_type = #tpu.core_type<tc>, window_params = [{transform_indices = @transform_0, window_bounds = array<i64: 8, 16>}, {pipeline_mode = #tpu.pipeline_mode<synchronous>, transform_indices = @transform_1, window_bounds = array<i64: 16, 32>}, {pipeline_mode = #tpu.pipeline_mode<synchronous>, transform_indices = @transform_2, window_bounds = array<i64: 1, 32>}, {pipeline_mode = #tpu.pipeline_mode<synchronous>, transform_indices = @transform_3, window_bounds = array<i64: 32, 32>}, {pipeline_mode = #tpu.pipeline_mode<synchronous>, transform_indices = @transform_4, window_bounds = array<i64: 1, 32>}, {pipeline_mode = #tpu.pipeline_mode<synchronous>, transform_indices = @transform_5, window_bounds = array<i64: 32, 32>}, {pipeline_mode = #tpu.pipeline_mode<synchronous>, transform_indices = @transform_6, window_bounds = array<i64: 1, 32>}, {pipeline_mode = #tpu.pipeline_mode<synchronous>, transform_indices = @transform_7, window_bounds = array<i64: 32, 128>}, {pipeline_mode = #tpu.pipeline_mode<synchronous>, transform_indices = @transform_8, window_bounds = array<i64: 1, 128>}, {transform_indices = @transform_9, window_bounds = array<i64: 8, 128>}]} {
    %c0 = arith.constant 0 : index
    %c0_0 = arith.constant 0 : index
    %0 = vector.load %arg1[%c0, %c0_0] : memref<8x16xf32, #tpu.memory_space<vmem>>, vector<8x16xf32>
    %1 = arith.truncf %0 : vector<8x16xf32> to vector<8x16xbf16>
    %c0_1 = arith.constant 0 : index
    %c0_2 = arith.constant 0 : index
    %2 = vector.load %arg2[%c0_1, %c0_2] : memref<16x32xbf16, #tpu.memory_space<vmem>>, vector<16x32xbf16>
    %cst = arith.constant dense<0.000000e+00> : vector<8x32xf32>
    %3 = tpu.matmul %1, %2, %cst {dimension_numbers = #tpu.dot_dimension_numbers<[1], [0], [0], [1], [0, 0, 1, 1], [], []>} : vector<8x16xbf16>, vector<16x32xbf16>, vector<8x32xf32> -> vector<8x32xf32>
    %c0_3 = arith.constant 0 : index
    %c0_4 = arith.constant 0 : index
    %4 = vector.load %arg3[%c0_3, %c0_4] : memref<1x32xf32, #tpu.memory_space<vmem>>, vector<1x32xf32>
    %5 = vector.broadcast %4 : vector<1x32xf32> to vector<8x32xf32>
    %6 = arith.addf %3, %5 : vector<8x32xf32>
    %cst_5 = arith.constant 0.000000e+00 : f32
    %7 = vector.broadcast %cst_5 : f32 to vector<8x32xf32>
    %8 = arith.maximumf %6, %7 : vector<8x32xf32>
    %9 = arith.truncf %8 : vector<8x32xf32> to vector<8x32xbf16>
    %c0_6 = arith.constant 0 : index
    %c0_7 = arith.constant 0 : index
    %10 = vector.load %arg4[%c0_6, %c0_7] : memref<32x32xbf16, #tpu.memory_space<vmem>>, vector<32x32xbf16>
    %cst_8 = arith.constant dense<0.000000e+00> : vector<8x32xf32>
    %11 = tpu.matmul %9, %10, %cst_8 {dimension_numbers = #tpu.dot_dimension_numbers<[1], [0], [0], [1], [0, 0, 1, 1], [], []>} : vector<8x32xbf16>, vector<32x32xbf16>, vector<8x32xf32> -> vector<8x32xf32>
    %c0_9 = arith.constant 0 : index
    %c0_10 = arith.constant 0 : index
    %12 = vector.load %arg5[%c0_9, %c0_10] : memref<1x32xf32, #tpu.memory_space<vmem>>, vector<1x32xf32>
    %13 = vector.broadcast %12 : vector<1x32xf32> to vector<8x32xf32>
    %14 = arith.addf %11, %13 : vector<8x32xf32>
    %cst_11 = arith.constant 0.000000e+00 : f32
    %15 = vector.broadcast %cst_11 : f32 to vector<8x32xf32>
    %16 = arith.maximumf %14, %15 : vector<8x32xf32>
    %17 = arith.truncf %16 : vector<8x32xf32> to vector<8x32xbf16>
    %c0_12 = arith.constant 0 : index
    %c0_13 = arith.constant 0 : index
    %18 = vector.load %arg6[%c0_12, %c0_13] : memref<32x32xbf16, #tpu.memory_space<vmem>>, vector<32x32xbf16>
    %cst_14 = arith.constant dense<0.000000e+00> : vector<8x32xf32>
    %19 = tpu.matmul %17, %18, %cst_14 {dimension_numbers = #tpu.dot_dimension_numbers<[1], [0], [0], [1], [0, 0, 1, 1], [], []>} : vector<8x32xbf16>, vector<32x32xbf16>, vector<8x32xf32> -> vector<8x32xf32>
    %c0_15 = arith.constant 0 : index
    %c0_16 = arith.constant 0 : index
    %20 = vector.load %arg7[%c0_15, %c0_16] : memref<1x32xf32, #tpu.memory_space<vmem>>, vector<1x32xf32>
    %21 = vector.broadcast %20 : vector<1x32xf32> to vector<8x32xf32>
    %22 = arith.addf %19, %21 : vector<8x32xf32>
    %cst_17 = arith.constant 0.000000e+00 : f32
    %23 = vector.broadcast %cst_17 : f32 to vector<8x32xf32>
    %24 = arith.maximumf %22, %23 : vector<8x32xf32>
    %25 = arith.truncf %24 : vector<8x32xf32> to vector<8x32xbf16>
    %c0_18 = arith.constant 0 : index
    %c0_19 = arith.constant 0 : index
    %26 = vector.load %arg8[%c0_18, %c0_19] : memref<32x128xbf16, #tpu.memory_space<vmem>>, vector<32x128xbf16>
    %cst_20 = arith.constant dense<0.000000e+00> : vector<8x128xf32>
    %27 = tpu.matmul %25, %26, %cst_20 {dimension_numbers = #tpu.dot_dimension_numbers<[1], [0], [0], [1], [0, 0, 1, 1], [], []>} : vector<8x32xbf16>, vector<32x128xbf16>, vector<8x128xf32> -> vector<8x128xf32>
    %c0_21 = arith.constant 0 : index
    %c0_22 = arith.constant 0 : index
    %28 = vector.load %arg9[%c0_21, %c0_22] : memref<1x128xf32, #tpu.memory_space<vmem>>, vector<1x128xf32>
    %29 = vector.broadcast %28 : vector<1x128xf32> to vector<8x128xf32>
    %30 = arith.addf %27, %29 : vector<8x128xf32>
    %cst_23 = arith.constant 0.000000e+00 : f32
    %31 = vector.broadcast %cst_23 : f32 to vector<8x128xf32>
    %32 = arith.subf %31, %30 : vector<8x128xf32>
    %33 = math.exp %32 : vector<8x128xf32>
    %cst_24 = arith.constant 1.000000e+00 : f32
    %34 = vector.broadcast %cst_24 : f32 to vector<8x128xf32>
    %35 = arith.addf %34, %33 : vector<8x128xf32>
    %36 = tpu.reciprocal %35 {approx = true} : vector<8x128xf32> -> vector<8x128xf32>
    %c0_25 = arith.constant 0 : index
    %c0_26 = arith.constant 0 : index
    %37 = vector.load %arg10[%c0_25, %c0_26] : memref<8x128xf32, #tpu.memory_space<vmem>>, vector<8x128xf32>
    tpu.vector_store %arg10[%c0_25, %c0_26], %36 {strides = array<i32>} : memref<8x128xf32, #tpu.memory_space<vmem>>, vector<8x128xf32>,
    return
  }
  func.func @transform_0(%arg0: i32) -> (i32, i32) {
    %c0_i32 = arith.constant 0 : i32
    %c0_i32_0 = arith.constant 0 : i32
    return %arg0, %c0_i32 : i32, i32
  }
  func.func @transform_1(%arg0: i32) -> (i32, i32) {
    %c0_i32 = arith.constant 0 : i32
    %c0_i32_0 = arith.constant 0 : i32
    %c0_i32_1 = arith.constant 0 : i32
    return %c0_i32, %c0_i32_0 : i32, i32
  }
  func.func @transform_2(%arg0: i32) -> (i32, i32) {
    %c0_i32 = arith.constant 0 : i32
    %c0_i32_0 = arith.constant 0 : i32
    %c0_i32_1 = arith.constant 0 : i32
    return %c0_i32, %c0_i32_0 : i32, i32
  }
  func.func @transform_3(%arg0: i32) -> (i32, i32) {
    %c0_i32 = arith.constant 0 : i32
    %c0_i32_0 = arith.constant 0 : i32
    %c0_i32_1 = arith.constant 0 : i32
    return %c0_i32, %c0_i32_0 : i32, i32
  }
  func.func @transform_4(%arg0: i32) -> (i32, i32) {
    %c0_i32 = arith.constant 0 : i32
    %c0_i32_0 = arith.constant 0 : i32
    %c0_i32_1 = arith.constant 0 : i32
    return %c0_i32, %c0_i32_0 : i32, i32
  }
  func.func @transform_5(%arg0: i32) -> (i32, i32) {
    %c0_i32 = arith.constant 0 : i32
    %c0_i32_0 = arith.constant 0 : i32
    %c0_i32_1 = arith.constant 0 : i32
    return %c0_i32, %c0_i32_0 : i32, i32
  }
  func.func @transform_6(%arg0: i32) -> (i32, i32) {
    %c0_i32 = arith.constant 0 : i32
    %c0_i32_0 = arith.constant 0 : i32
    %c0_i32_1 = arith.constant 0 : i32
    return %c0_i32, %c0_i32_0 : i32, i32
  }
  func.func @transform_7(%arg0: i32) -> (i32, i32) {
    %c0_i32 = arith.constant 0 : i32
    %c0_i32_0 = arith.constant 0 : i32
    %c0_i32_1 = arith.constant 0 : i32
    return %c0_i32, %c0_i32_0 : i32, i32
  }
  func.func @transform_8(%arg0: i32) -> (i32, i32) {
    %c0_i32 = arith.constant 0 : i32
    %c0_i32_0 = arith.constant 0 : i32
    %c0_i32_1 = arith.constant 0 : i32
    return %c0_i32, %c0_i32_0 : i32, i32
  }
  func.func @transform_9(%arg0: i32) -> (i32, i32) {
    %c0_i32 = arith.constant 0 : i32
    %c0_i32_0 = arith.constant 0 : i32
    return %arg0, %c0_i32 : i32, i32
  }
}

</mosaic_0001>

<bundles_post_ra>
// kernel: tpu_custom_call.1
= control target key start
LH: loop header
LB: loop body
LE: loop exit
PB: predicated region body
PF: predicated region fallthrough
CT: control target
= control target key end

     0   :  { %14 = vsyncpa [#allocation3], 0  ;;  %s703_s0 = inlined_call_operand.hbm [shape: f32[8,16], index: 0, kind: input, shape index: {}]   ;;  %s704_s1 = inlined_call_operand.hbm [shape: bf16[16,32], index: 1, kind: input, shape index: {}]   ;;  %s705_s2 = inlined_call_operand.vmem [shape: f32[1,32], index: 2, kind: input, shape index: {}]   ;;  %s706_s3 = inlined_call_operand.hbm [shape: bf16[32,32], index: 3, kind: input, shape index: {}]   ;;  %s707_s4 = inlined_call_operand.vmem [shape: f32[1,32], index: 4, kind: input, shape index: {}]   ;;  %s708_s5 = inlined_call_operand.hbm [shape: bf16[32,32], index: 5, kind: input, shape index: {}]   ;;  %s709_s6 = inlined_call_operand.vmem [shape: f32[1,32], index: 6, kind: input, shape index: {}]   ;;  %s710_s7 = inlined_call_operand.hbm [shape: bf16[32,128], index: 7, kind: input, shape index: {}]   ;;  %s711_s8 = inlined_call_operand.vmem [shape: f32[1,128], index: 8, kind: input, shape index: {}]   ;;  %s712_s9 = inlined_call_operand.hbm [shape: f32[8,128], index: 9, kind: output, shape index: {}]  }
   0x1   :  { %15 = vsyncpa [#allocation6], 0 }
   0x2   :  { %16 = vsyncpa [#allocation9], 0 }
   0x3   :  { %17 = vsyncpa [#allocation4], 0  ;;  %s594_s30 = smov [#allocation5]  }
   0x4   :  { %s33_s10 = sshll.u32 %s594_s30, 4  ;;  %s34_s10 = int_to_ptr.vmem [resolvable:$true] %s33_s10 }
   0x5   :  { %s474_s11 = scalar_lea.vmem %s34_s10, 128  ;;  %p479_p1 = scmp.lt.s32.totalorder %s34_s10, %s34_s10 }
   0x6   :  { %p475_p0 = scmp.ne.s32.totalorder %s34_s10, %s474_s11  ;;  %p480_p2 = scmp.lt.s32.totalorder %s474_s11, %s474_s11 }
   0x8   :  { %p481_p3 = por %p480_p2, %p479_p1 }
   0xa   :  { %p482_p4 = pnand %p481_p3, %p475_p0 }
   0xc   :  { %485 = shalt.err (!%p482_p4)
}
   0xd   :  { %s595_s12 = smov 64   ;;  %s596_s13 = smov 4  }
   0xe   :  { %39 = dma.hbm_to_vmem [thread:$0]  %s704_s1, 128, %s34_s10, [#allocation6], %s595_s12, %s595_s12, %s596_s13  }
   0xf   :  { %s597_s16 = smov [#allocation8]   ;;  %s598_s18 = smov [#allocation2]  }
  0x10   :  { %s61_s17 = sshll.u32 %s597_s16, 4  ;;  %s24_s19 = sshll.u32 %s598_s18, 4  ;;  %s62_s17 = int_to_ptr.vmem [resolvable:$true] %s61_s17  ;;  %s25_s19 = int_to_ptr.vmem [resolvable:$true] %s24_s19 }
  0x11   :  { %s494_s20 = scalar_lea.vmem %s62_s17, 256  ;;  %p499_p6 = scmp.lt.s32.totalorder %s62_s17, %s62_s17 }
  0x12   :  { %p495_p5 = scmp.ne.s32.totalorder %s62_s17, %s494_s20  ;;  %p500_p7 = scmp.lt.s32.totalorder %s494_s20, %s494_s20 }
  0x14   :  { %p501_p8 = por %p500_p7, %p499_p6 }
  0x16   :  { %p502_p9 = pnand %p501_p8, %p495_p5 }
  0x18   :  { %505 = shalt.err (!%p502_p9)
}
  0x19   :  { %67 = dma.hbm_to_vmem [thread:$0]  %s708_s5, 256, %s62_s17, [#allocation9], %s595_s12, %s595_s12, %s596_s13  }
  0x1a   :  { %s514_s1 = scalar_lea.vmem %s25_s19, 128  ;;  %p519_p11 = scmp.lt.s32.totalorder %s25_s19, %s25_s19 }
  0x1b   :  { %p515_p10 = scmp.ne.s32.totalorder %s25_s19, %s514_s1  ;;  %p520_p12 = scmp.lt.s32.totalorder %s514_s1, %s514_s1 }
  0x1d   :  { %p521_p13 = por %p520_p12, %p519_p11 }
  0x1f   :  { %p522_p0 = pnand %p521_p13, %p515_p10 }
  0x21   :  { %525 = shalt.err (!%p522_p0)
}
  0x22   :  { %27 = dma.hbm_to_vmem [thread:$0]  %s703_s0, 128, %s25_s19, [#allocation3]  }
  0x23   :  { %s599_s25 = smov [#allocation7]   ;;  %s600_s27 = smov [#allocation10]  }
  0x24   :  { %s47_s26 = sshll.u32 %s599_s25, 4  ;;  %s75_s28 = sshll.u32 %s600_s27, 4  ;;  %s48_s26 = int_to_ptr.vmem [resolvable:$true] %s47_s26  ;;  %s76_s28 = int_to_ptr.vmem [resolvable:$true] %s75_s28 }
  0x25   :  { %s534_s29 = scalar_lea.vmem %s48_s26, 256  ;;  %p539_p2 = scmp.lt.s32.totalorder %s48_s26, %s48_s26 }
  0x26   :  { %p535_p1 = scmp.ne.s32.totalorder %s48_s26, %s534_s29  ;;  %p540_p3 = scmp.lt.s32.totalorder %s534_s29, %s534_s29 }
  0x28   :  { %p541_p4 = por %p540_p3, %p539_p2 }
  0x2a   :  { %p542_p5 = pnand %p541_p4, %p535_p1 }
  0x2c   :  { %545 = shalt.err (!%p542_p5)
}
  0x2d   :  { %53 = dma.hbm_to_vmem [thread:$0]  %s706_s3, 256, %s48_s26, [#allocation6], %s595_s12, %s595_s12, %s596_s13  }
  0x2e   :  { %s554_s0 = scalar_lea.vmem %s76_s28, 256  ;;  %p559_p7 = scmp.lt.s32.totalorder %s76_s28, %s76_s28 }
  0x2f   :  { %p555_p6 = scmp.ne.s32.totalorder %s76_s28, %s554_s0  ;;  %p560_p8 = scmp.lt.s32.totalorder %s554_s0, %s554_s0 }
  0x31   :  { %p561_p9 = por %p560_p8, %p559_p7 }
  0x33   :  { %p562_p10 = pnand %p561_p9, %p555_p6 }
  0x35   :  { %565 = shalt.err (!%p562_p10)
}
  0x36   :  { %81 = dma.hbm_to_vmem [thread:$0]  %s710_s7, 256, %s76_s28, [#allocation9], %s595_s12, %s595_s12, %s596_s13  }
  0x37   :  { %586 = dma.done.wait [#allocation3], 128  }
  0x38   :  { %587 = vsyncadd [#allocation3], 4294967168 }
  0x39   :  { %588 = dma.done.wait [#allocation6], 384  }
  0x3a   :  { %589 = vsyncadd [#allocation6], 4294966912 }
  0x3b   :  { %590 = dma.done.wait [#allocation9], 512  }
  0x3c   :  { %591 = vsyncadd [#allocation9], 4294966784  ;;  %v601_v0 = vmov 0.0   ;;  %vm602_vm0 = vmmov 0   ;;  %v455_v1 = vld [vmem:[#allocation5] sm:$0xff]   ;;  %v100_v2 = vld [vmem:[#allocation2] sm:$0xff] }
  0x3d   :  { %415 = vmatprep.subr.bf16.mxu0 %v601_v0  ;;  %417 = vmatprep.mubr.msk.bf16.mxu0 %vm602_vm0, %v601_v0  ;;  %vm117_vm1 = vcmask 130048   ;;  %v101_v3 = vpack.c.bf16 %v100_v2, %v100_v2  ;;  %v456_v4 = vld [vmem:[#allocation7 + $0x8] sm:$0xff]   ;;  %v457_v5 = vld [vmem:[#allocation7] sm:$0xff]   ;;  %v458_v6 = vld [vmem:[#allocation8 + $0x8] sm:$0xff]   ;;  %vm186_vm2 = vcmask 261120  }
  0x3e   :  { %421 = vmatprep.subr.bf16.mxu1 %v601_v0  ;;  %425 = vmatprep.mubr.msk.bf16.mxu1 %vm602_vm0, %v601_v0  ;;  %v389_v7 = vld [vmem:[%s705_s2] ss:$0 sm:$0xff]  ;;  %v460_v16 = vld [vmem:[#allocation10 + $0x8] sm:$0xff]   ;;  %v461_v25 = vld [vmem:[#allocation10] sm:$0xff]  }
  0x3f   :  { %416 = vmatpush3.bf16.msra.mxu0 %v455_v1  ;;  %422 = vmatpush3.bf16.msra.mxu1 %v456_v4  ;;  %v459_v15 = vld [vmem:[#allocation8] sm:$0xff]  }
  0x40   :  { %429 = vmatprep.subr.bf16.mxu0 %v601_v0  ;;  %423 = vmatprep.subr.bf16.mxu1 %v601_v0  ;;  %v392_v17 = vld [vmem:[%s707_s4] ss:$0 sm:$0xff] }
  0x41   :  { %v396_v26 = vld [vmem:[%s709_s6] ss:$0 sm:$0xff]  ;;  %s603_s6 = smov [#allocation11]  }
  0x42   :  { %418 = vmatmul.mubr.msk.bf16.vlgmr.msra.gmra.mxu0 %vm117_vm1, %v101_v3  ;;  %v400_v34 = vld [vmem:[%s711_s8] ss:$0 sm:$0xff]  ;;  %s378_s16 = sshll.u32 %s603_s6, 4  ;;  %s379_s16 = int_to_ptr.vmem [resolvable:$true] %s378_s16 }
  0x43   :  { %433 = vmatprep.mubr.msk.bf16.mxu0 %vm602_vm0, %v601_v0  ;;  %424 = vmatpush3.bf16.msra.mxu1 %v457_v5  ;;  %s566_s17 = scalar_lea.vmem %s379_s16, 128  ;;  %p571_p12 = scmp.lt.s32.totalorder %s379_s16, %s379_s16 }
  0x44   :  { %437 = vmatprep.subr.bf16.mxu1 %v601_v0  ;;  %430 = vmatpush3.bf16.msra.mxu0 %v458_v6  ;;  %p567_p11 = scmp.ne.s32.totalorder %s379_s16, %s566_s17  ;;  %p572_p13 = scmp.lt.s32.totalorder %s566_s17, %s566_s17 }
  0x45   :  { %431 = vmatprep.subr.bf16.mxu0 %v601_v0 }
  0x46   :  { %p573_p0 = por %p572_p13, %p571_p12 }
  0x48   :  { %432 = vmatpush3.bf16.msra.mxu0 %v459_v15  ;;  %p574_p1 = pnand %p573_p0, %p567_p11 }
 0x102   :  { %v155_v8 = vpop.f32.mrf.mxu0 }
 0x103   :  { %v156_v9 = vadd.f32 %v389_v7, %v155_v8 }
 0x104   :  { %v419_v10 = vpop.f32.mrf.mxu0 }
 0x105   :  { %v161_v11 = vmax.f32 %v156_v9, 0.0 }
 0x106   :  { %v158_v12 = vpop.f32.mrf.mxu0 }
 0x107   :  { %v162_v13 = vpack.c.bf16 %v161_v11, %v161_v11 }
 0x108   :  { %v420_v14 = vpop.f32.mrf.mxu0 }
 0x109   :  { %426 = vmatmul.mubr.msk.bf16.vlgmr.msra.gmra.mxu1 %vm186_vm2, %v162_v13 }
 0x10a   :  { %441 = vmatprep.mubr.msk.bf16.mxu1 %vm602_vm0, %v601_v0  ;;  %438 = vmatpush3.bf16.msra.mxu1 %v460_v16 }
 0x10b   :  { %439 = vmatprep.subr.bf16.mxu1 %v601_v0 }
 0x10e   :  { %440 = vmatpush3.bf16.msra.mxu1 %v461_v25 }
 0x1c9   :  { %v224_v18 = vpop.f32.mrf.mxu1 }
 0x1ca   :  { %v225_v19 = vadd.f32 %v392_v17, %v224_v18 }
 0x1cb   :  { %v427_v20 = vpop.f32.mrf.mxu1 }
 0x1cc   :  { %v230_v21 = vmax.f32 %v225_v19, 0.0 }
 0x1cd   :  { %v227_v22 = vpop.f32.mrf.mxu1 }
 0x1ce   :  { %v231_v23 = vpack.c.bf16 %v230_v21, %v230_v21 }
 0x1cf   :  { %v428_v24 = vpop.f32.mrf.mxu1 }
 0x1d0   :  { %434 = vmatmul.mubr.msk.bf16.vlgmr.msra.gmra.mxu0 %vm186_vm2, %v231_v23 }
 0x290   :  { %v292_v27 = vpop.f32.mrf.mxu0 }
 0x291   :  { %v293_v28 = vadd.f32 %v396_v26, %v292_v27 }
 0x292   :  { %v435_v29 = vpop.f32.mrf.mxu0 }
 0x293   :  { %v298_v30 = vmax.f32 %v293_v28, 0.0 }
 0x294   :  { %v295_v31 = vpop.f32.mrf.mxu0 }
 0x295   :  { %v299_v32 = vpack.c.bf16 %v298_v30, %v298_v30 }
 0x296   :  { %v436_v33 = vpop.f32.mrf.mxu0 }
 0x297   :  { %442 = vmatmul.mubr.msk.bf16.vlgmr.msra.gmra.mxu1 %vm186_vm2, %v299_v32 }
 0x357   :  { %v360_v35 = vpop.f32.mrf.mxu1 }
 0x358   :  { %v361_v36 = vadd.f32 %v400_v34, %v360_v35 }
 0x359   :  { %v443_v37 = vpop.f32.mrf.mxu1 }
 0x35a   :  { %v366_v38 = vsub.f32 0.0, %v361_v36 }
 0x35b   :  { %v363_v39 = vpop.f32.mrf.mxu1 }
 0x35c   :  { %v367_v40 = vmul.f32 1.442695, %v366_v38 }
 0x35d   :  { %v444_v41 = vpop.f32.mrf.mxu1 }
 0x35e   :  { %462 = vpow2.f32 %v367_v40 }
 0x36b   :  { %v463_v42 = vpop.eup %462 }
 0x36c   :  { %v369_v43 = vadd.f32 1.0, %v463_v42 }
 0x36e   :  { %464 = vrcp.f32 %v369_v43 }
 0x37b   :  { %v465_v44 = vpop.eup %464 }
 0x37c   :  { %371 = vst [vmem:[#allocation11] sm:$0xff] %v465_v44 }
 0x37d   :  { %577 = shalt.err (!%p574_p1)
}
 0x37e   :  { %381 = dma.vmem_to_hbm [thread:$0]  %s379_s16, 128, %s712_s9, [#allocation4]  }
 0x37f   :  { %592 = dma.done.wait [#allocation4], 128  }
 0x380   :  { %593 = vsyncadd [#allocation4], 4294967168 }
 0x381   :  { %385 = vsyncpa [#allocation3], 1 }
 0x382   :  { %386 = vsyncpa [#allocation6], 1 }
 0x383   :  { %387 = vsyncpa [#allocation9], 1 }
 0x384   :  { %388 = vsyncpa [#allocation4], 1 }

</bundles_post_ra>
